<compile_context>
chip_gen: v5e
topology: v5e:2x2
jax: 0.10.0
libtpu: 0.0.40
codegen_flags: <defaults>
</compile_context>

<pallas_src>
import jax
import jax.numpy as jnp
from jax import lax
from jax.experimental import pallas as pl
from jax.experimental.pallas import tpu as pltpu

_SUBLANE = 8
_NUM_CORE_SPLITS = 2               # leading "parallel" axis (v7x megacore); no harm on 1-TC chips
_MAX_BLOCK_BYTES = 2 * 1024 * 1024
_MIN_BLOCK_BYTES = 128 * 1024
_VMEM_HEADROOM_BYTES = 8 * 1024 * 1024


def _cdiv(a, b):
    return -(-a // b)


def _round_up(x, m):
    return _cdiv(x, m) * m


def _vmem_limit_bytes():
    """Generation-aware scoped-VMEM limit: ~48 MiB on v7x (64 MiB physical),
    up to 96 MiB on v5e/v6e (128 MiB physical)."""
    try:
        cap = int(pltpu.get_tpu_info().vmem_capacity_bytes)
    except Exception:
        cap = 64 * 1024 * 1024     # conservative fallback: v7x per-core VMEM
    limit = min(cap * 3 // 4, 96 * 1024 * 1024)
    return max(min(limit, cap), 32 * 1024 * 1024)


def _fold_long_rows(rows, lanes, itemsize, target_bytes):
    """Fold the lane axis into rows (sum-invariant contiguous reshape) when even
    a single 8-row slab would exceed the per-input block budget."""
    while (_SUBLANE * lanes * itemsize > target_bytes
           and lanes % 2 == 0 and lanes // 2 >= 128):
        lanes //= 2
        rows *= 2
    # TODO(synk): a single 8-row slab can still exceed the budget when T is odd
    # and huge; that pathological case would need a second (lane) grid axis.
    return rows, lanes


def _make_kernel(metas, group_is_z, steps, total_blocks):
    """metas: per input (nb, blk_rows, rows, lanes, is_z, acc_idx)."""
    n_in = len(metas)

    def kernel(*refs):
        in_refs = refs[:n_in]
        out_ref = refs[n_in]
        acc_refs = refs[n_in + 1:]
        c = pl.program_id(0)
        i = pl.program_id(1)
        g = i * _NUM_CORE_SPLITS + c          # global block id (round-robin over cores)

        @pl.when(i == 0)
        def _init():
            for acc in acc_refs:
                acc[...] = jnp.zeros_like(acc)

        for (nb, blk_rows, rows, lanes, is_z, acc_idx), x_ref in zip(metas, in_refs):
            acc = acc_refs[acc_idx]

            def add(masked, x_ref=x_ref, acc=acc, blk_rows=blk_rows,
                    rows=rows, lanes=lanes, is_z=is_z):
                x = x_ref[...].astype(jnp.float32)
                contrib = x * x if is_z else x
                if masked:
                    row_ids = (g * blk_rows
                               + lax.broadcasted_iota(jnp.int32, contrib.shape, 0))
                    contrib = jnp.where(row_ids < rows, contrib, 0.0)
                if blk_rows > _SUBLANE:
                    # Fold row slabs to the (8, lanes) accumulator shape with
                    # pure VPU adds (sublane-aligned reshape, no XLU).
                    contrib = contrib.reshape(
                        blk_rows // _SUBLANE, _SUBLANE, lanes).sum(axis=0)
                acc[...] += contrib

            ragged = (rows % blk_rows) != 0
            if nb == total_blocks and not ragged:
                add(False)                                       # unconditional fast path
            elif not ragged:
                pl.when(g < nb)(lambda add=add: add(False))      # gated, unmasked
            else:
                if nb > 1:
                    pl.when(g < nb - 1)(lambda add=add: add(False))
                pl.when(g == nb - 1)(lambda add=add: add(True))  # mask only last block

        @pl.when(i == steps - 1)
        def _finalize():
            z_total = jnp.float32(0.0)
            s_total = jnp.float32(0.0)
            for gz, acc in zip(group_is_z, acc_refs):
                part = jnp.sum(acc[...])
                if gz:
                    z_total = z_total + part
                else:
                    s_total = s_total + part
            r = lax.broadcasted_iota(jnp.int32, (_SUBLANE, 128), 0)
            l = lax.broadcasted_iota(jnp.int32, (_SUBLANE, 128), 1)
            out_ref[...] = jnp.where(
                (r == 0) & (l == 0), z_total,
                jnp.where((r == 0) & (l == 1), s_total, jnp.float32(0.0)))

    return kernel


def waveglow_loss(model_output, sigma=1.0, block_byte_target=None):
    """Matches WaveGlowLoss.forward semantics.

    model_output = (z, log_s_list, log_det_W_list)
      z:              (B, C, T)
      log_s_list:     list of (B, C_i, T_i) tensors
      log_det_W_list: list of scalars
    """
    z, log_s_list, log_det_W_list = model_output
    tensors = [(z, True)] + [(ls, False) for ls in log_s_list]
    n_in = len(tensors)

    vmem_limit = _vmem_limit_bytes()
    if block_byte_target is None:
        # Only the double-buffered input blocks matter now (accumulators are tiny).
        usable = max(vmem_limit - _VMEM_HEADROOM_BYTES, 4 * 1024 * 1024)
        block_byte_target = max(_MIN_BLOCK_BYTES,
                                min(_MAX_BLOCK_BYTES, usable // (2 * n_in)))

    # ---- flatten each (B, C, T) to a lane-dense (rows, lanes) slab ----------
    shapes = []
    for t, is_z in tensors:
        assert t.ndim == 3, "expected (B, C, T) tensors"
        B, C, T = t.shape
        rows, lanes = _fold_long_rows(B * C, T, t.dtype.itemsize, block_byte_target)
        shapes.append((rows, lanes, t.dtype.itemsize, is_z))

    # ---- one shared, balanced grid ------------------------------------------
    nb_budget = []
    for rows, lanes, isz, _ in shapes:
        blk_cap = max(_SUBLANE,
                      (block_byte_target // (lanes * isz)) // _SUBLANE * _SUBLANE)
        nb_budget.append(_cdiv(rows, blk_cap))
    max_blocks = max(_cdiv(rows, _SUBLANE) for rows, _, _, _ in shapes)
    # >= 2*splits blocks (when possible) so DMA/compute overlap exists even for
    # tiny problems; never more blocks than any input could usefully provide.
    total_blocks = min(max(max(nb_budget), 2 * _NUM_CORE_SPLITS), max_blocks)
    total_blocks = _round_up(total_blocks, _NUM_CORE_SPLITS)
    steps = total_blocks // _NUM_CORE_SPLITS

    # ---- per-input block sizing, shared accumulator groups ------------------
    metas, inputs_2d, in_specs = [], [], []
    group_index, group_is_z, group_shapes = {}, [], []
    for (t, _), (rows, lanes, isz, is_z) in zip(tensors, shapes):
        x2d = t.reshape(rows, lanes)           # contiguous reshape: no data movement
        if rows < _SUBLANE:
            blk_rows = rows                    # tiny input: full-extent single block
        else:
            blk_rows = _round_up(_cdiv(rows, total_blocks), _SUBLANE)
        nb = _cdiv(rows, blk_rows)
        assert nb <= total_blocks
        assert blk_rows * lanes * isz <= max(block_byte_target,
                                             _SUBLANE * lanes * isz)

        acc_rows = blk_rows if blk_rows < _SUBLANE else _SUBLANE
        key = (is_z, lanes, acc_rows)
        if key not in group_index:
            group_index[key] = len(group_is_z)
            group_is_z.append(is_z)
            group_shapes.append((acc_rows, lanes))
        acc_idx = group_index[key]

        metas.append((nb, blk_rows, rows, lanes, is_z, acc_idx))
        inputs_2d.append(x2d)

        if nb == total_blocks:
            idx = lambda c, i: (i * _NUM_CORE_SPLITS + c, 0)
        else:
            # Clamp: the pipeline may skip the redundant DMA; the kernel gates
            # the accumulation off for the out-of-range global blocks.
            idx = lambda c, i, _nb=nb: (
                jnp.minimum(i * _NUM_CORE_SPLITS + c, _nb - 1), 0)
        in_specs.append(pl.BlockSpec((blk_rows, lanes), idx))

    scratch_shapes = [pltpu.VMEM(shape, jnp.float32) for shape in group_shapes]

    kernel = _make_kernel(metas, group_is_z, steps, total_blocks)

    sums = pl.pallas_call(
        kernel,
        out_shape=jax.ShapeDtypeStruct((_NUM_CORE_SPLITS * _SUBLANE, 128),
                                       jnp.float32),
        grid_spec=pltpu.PrefetchScalarGridSpec(
            num_scalar_prefetch=0,
            grid=(_NUM_CORE_SPLITS, steps),
            in_specs=in_specs,
            out_specs=pl.BlockSpec((_SUBLANE, 128), lambda c, i: (c, 0)),
            scratch_shapes=scratch_shapes,
        ),
        compiler_params=pltpu.CompilerParams(
            dimension_semantics=("parallel", "arbitrary"),
            vmem_limit_bytes=vmem_limit,
        ),
    )(*inputs_2d)

    parts = sums.reshape(_NUM_CORE_SPLITS, _SUBLANE, 128)
    z_sq_sum = jnp.sum(parts[:, 0, 0])
    log_s_total = jnp.sum(parts[:, 0, 1])

    log_det_W_total = jnp.float32(0.0)
    for w in log_det_W_list:
        log_det_W_total = log_det_W_total + jnp.asarray(w, jnp.float32)

    sigma = float(sigma)
    loss = z_sq_sum / (2.0 * sigma * sigma) - log_s_total - log_det_W_total
    denom = z.shape[0] * z.shape[1] * z.shape[2]
    return loss / jnp.float32(denom)


def _reference_loss(model_output, sigma=1.0):
    """Pure-JAX reference for correctness checking."""
    z, log_s_list, log_det_W_list = model_output
    log_s_total = sum(jnp.sum(ls.astype(jnp.float32)) for ls in log_s_list)
    log_det_W_total = sum(jnp.asarray(w, jnp.float32) for w in log_det_W_list)
    zf = z.astype(jnp.float32)
    loss = jnp.sum(zf * zf) / (2.0 * sigma * sigma) - log_s_total - log_det_W_total
    return loss / (z.shape[0] * z.shape[1] * z.shape[2])


if __name__ == "__main__":
    key = jax.random.PRNGKey(0)
    keys = jax.random.split(key, 12)

    # Test 1: small shapes consistent with a WaveGlow forward (f32).
    z = jax.random.normal(keys[0], (2, 4, 16), dtype=jnp.float32)
    log_s_list = [
        jax.random.normal(keys[1], (2, 2, 16), dtype=jnp.float32) * 0.1,
        jax.random.normal(keys[2], (2, 2, 16), dtype=jnp.float32) * 0.1,
    ]
    log_det_W_list = list(jax.random.normal(keys[3], (2,), dtype=jnp.float32))
    model_output = (z, log_s_list, log_det_W_list)

    out = jax.block_until_ready(waveglow_loss(model_output, sigma=1.0))
    ref = jax.block_until_ready(_reference_loss(model_output, sigma=1.0))
    assert jnp.allclose(out, ref, rtol=1e-5, atol=1e-5), (out, ref)

    # Test 2: force a tiny block budget to exercise multi-block / gated /
    # last-block-masked paths (mixed block counts, rows not % 8).
    z2 = jax.random.normal(keys[4], (2, 10, 512), dtype=jnp.float32)
    log_s_list2 = [
        jax.random.normal(keys[5], (2, 4, 512), dtype=jnp.float32) * 0.1,
        jax.random.normal(keys[6], (2, 6, 512), dtype=jnp.float32) * 0.1,
    ]
    log_det_W_list2 = [jnp.float32(0.3), jnp.float32(-0.7)]
    model_output2 = (z2, log_s_list2, log_det_W_list2)

    out2 = jax.block_until_ready(
        waveglow_loss(model_output2, sigma=0.9, block_byte_target=8 * 512 * 4)
    )
    ref2 = jax.block_until_ready(_reference_loss(model_output2, sigma=0.9))
    assert jnp.allclose(out2, ref2, rtol=1e-5, atol=1e-5), (out2, ref2)

    # Test 3: bf16 inputs (dtype-aware block sizing, f32 accumulation).
    z3 = jax.random.normal(keys[7], (2, 4, 16), dtype=jnp.bfloat16)
    log_s_list3 = [
        (jax.random.normal(keys[8], (2, 2, 16), dtype=jnp.float32) * 0.1
         ).astype(jnp.bfloat16),
        (jax.random.normal(keys[9], (2, 2, 16), dtype=jnp.float32) * 0.1
         ).astype(jnp.bfloat16),
    ]
    log_det_W_list3 = [jnp.float32(0.2), jnp.float32(-0.1)]
    model_output3 = (z3, log_s_list3, log_det_W_list3)

    out3 = jax.block_until_ready(waveglow_loss(model_output3, sigma=1.0))
    ref3 = jax.block_until_ready(_reference_loss(model_output3, sigma=1.0))
    assert jnp.allclose(out3, ref3, rtol=1e-3, atol=1e-3), (out3, ref3)

    print("KERNEL_OK")
</pallas_src>

<mosaic_0001>
module attributes {stable_mosaic.version = 11 : i64} {
  func.func @kernel(%arg0: i32, %arg1: i32, %arg2: memref<8x16xf32, #tpu.memory_space<vmem>>, %arg3: memref<4x16xf32, #tpu.memory_space<vmem>>, %arg4: memref<4x16xf32, #tpu.memory_space<vmem>>, %arg5: memref<8x128xf32, #tpu.memory_space<vmem>>, %arg6: memref<8x16xf32, #tpu.memory_space<vmem>>, %arg7: memref<4x16xf32, #tpu.memory_space<vmem>>) attributes {dimension_semantics = [#tpu.dimension_semantics<parallel>, #tpu.dimension_semantics<arbitrary>], iteration_bounds = array<i64: 2, 1>, scalar_prefetch = 0 : i64, scratch_operands = 2 : i64, tpu.core_type = #tpu.core_type<tc>, window_params = [{transform_indices = @transform_0, window_bounds = array<i64: 8, 16>}, {transform_indices = @transform_1, window_bounds = array<i64: 4, 16>}, {transform_indices = @transform_2, window_bounds = array<i64: 4, 16>}, {transform_indices = @transform_3, window_bounds = array<i64: 8, 128>}]} {
    %c2_i32 = arith.constant 2 : i32
    %0 = arith.muli %arg1, %c2_i32 : i32
    %1 = arith.addi %0, %arg0 : i32
    %c0_i32 = arith.constant 0 : i32
    %2 = arith.cmpi eq, %arg1, %c0_i32 : i32
    %3 = arith.extui %2 : i1 to i32
    %c0_i32_0 = arith.constant 0 : i32
    %4 = arith.cmpi ne, %3, %c0_i32_0 : i32
    scf.if %4 {
      %cst = arith.constant 0.000000e+00 : f32
      %17 = vector.broadcast %cst : f32 to vector<8x16xf32>
      %c0 = arith.constant 0 : index
      %c0_8 = arith.constant 0 : index
      %18 = vector.load %arg6[%c0, %c0_8] : memref<8x16xf32, #tpu.memory_space<vmem>>, vector<8x16xf32>
      tpu.vector_store %arg6[%c0, %c0_8], %17 {strides = array<i32>} : memref<8x16xf32, #tpu.memory_space<vmem>>, vector<8x16xf32>,
      %cst_9 = arith.constant 0.000000e+00 : f32
      %19 = vector.broadcast %cst_9 : f32 to vector<4x16xf32>
      %c0_10 = arith.constant 0 : index
      %c0_11 = arith.constant 0 : index
      %20 = vector.load %arg7[%c0_10, %c0_11] : memref<4x16xf32, #tpu.memory_space<vmem>>, vector<4x16xf32>
      tpu.vector_store %arg7[%c0_10, %c0_11], %19 {strides = array<i32>} : memref<4x16xf32, #tpu.memory_space<vmem>>, vector<4x16xf32>,
    } else {
    }
    %c1_i32 = arith.constant 1 : i32
    %5 = arith.cmpi slt, %1, %c1_i32 : i32
    %6 = arith.extui %5 : i1 to i32
    %c0_i32_1 = arith.constant 0 : i32
    %7 = arith.cmpi ne, %6, %c0_i32_1 : i32
    scf.if %7 {
      %c0 = arith.constant 0 : index
      %c0_8 = arith.constant 0 : index
      %17 = vector.load %arg2[%c0, %c0_8] : memref<8x16xf32, #tpu.memory_space<vmem>>, vector<8x16xf32>
      %18 = arith.mulf %17, %17 : vector<8x16xf32>
      %c0_9 = arith.constant 0 : index
      %c0_10 = arith.constant 0 : index
      %19 = vector.load %arg6[%c0_9, %c0_10] : memref<8x16xf32, #tpu.memory_space<vmem>>, vector<8x16xf32>
      %20 = arith.addf %19, %18 : vector<8x16xf32>
      %c0_11 = arith.constant 0 : index
      %c0_12 = arith.constant 0 : index
      %21 = vector.load %arg6[%c0_11, %c0_12] : memref<8x16xf32, #tpu.memory_space<vmem>>, vector<8x16xf32>
      tpu.vector_store %arg6[%c0_11, %c0_12], %20 {strides = array<i32>} : memref<8x16xf32, #tpu.memory_space<vmem>>, vector<8x16xf32>,
    } else {
    }
    %c1_i32_2 = arith.constant 1 : i32
    %8 = arith.cmpi slt, %1, %c1_i32_2 : i32
    %9 = arith.extui %8 : i1 to i32
    %c0_i32_3 = arith.constant 0 : i32
    %10 = arith.cmpi ne, %9, %c0_i32_3 : i32
    scf.if %10 {
      %c0 = arith.constant 0 : index
      %c0_8 = arith.constant 0 : index
      %17 = vector.load %arg3[%c0, %c0_8] : memref<4x16xf32, #tpu.memory_space<vmem>>, vector<4x16xf32>
      %c0_9 = arith.constant 0 : index
      %c0_10 = arith.constant 0 : index
      %18 = vector.load %arg7[%c0_9, %c0_10] : memref<4x16xf32, #tpu.memory_space<vmem>>, vector<4x16xf32>
      %19 = arith.addf %18, %17 : vector<4x16xf32>
      %c0_11 = arith.constant 0 : index
      %c0_12 = arith.constant 0 : index
      %20 = vector.load %arg7[%c0_11, %c0_12] : memref<4x16xf32, #tpu.memory_space<vmem>>, vector<4x16xf32>
      tpu.vector_store %arg7[%c0_11, %c0_12], %19 {strides = array<i32>} : memref<4x16xf32, #tpu.memory_space<vmem>>, vector<4x16xf32>,
    } else {
    }
    %c1_i32_4 = arith.constant 1 : i32
    %11 = arith.cmpi slt, %1, %c1_i32_4 : i32
    %12 = arith.extui %11 : i1 to i32
    %c0_i32_5 = arith.constant 0 : i32
    %13 = arith.cmpi ne, %12, %c0_i32_5 : i32
    scf.if %13 {
      %c0 = arith.constant 0 : index
      %c0_8 = arith.constant 0 : index
      %17 = vector.load %arg4[%c0, %c0_8] : memref<4x16xf32, #tpu.memory_space<vmem>>, vector<4x16xf32>
      %c0_9 = arith.constant 0 : index
      %c0_10 = arith.constant 0 : index
      %18 = vector.load %arg7[%c0_9, %c0_10] : memref<4x16xf32, #tpu.memory_space<vmem>>, vector<4x16xf32>
      %19 = arith.addf %18, %17 : vector<4x16xf32>
      %c0_11 = arith.constant 0 : index
      %c0_12 = arith.constant 0 : index
      %20 = vector.load %arg7[%c0_11, %c0_12] : memref<4x16xf32, #tpu.memory_space<vmem>>, vector<4x16xf32>
      tpu.vector_store %arg7[%c0_11, %c0_12], %19 {strides = array<i32>} : memref<4x16xf32, #tpu.memory_space<vmem>>, vector<4x16xf32>,
    } else {
    }
    %c0_i32_6 = arith.constant 0 : i32
    %14 = arith.cmpi eq, %arg1, %c0_i32_6 : i32
    %15 = arith.extui %14 : i1 to i32
    %c0_i32_7 = arith.constant 0 : i32
    %16 = arith.cmpi ne, %15, %c0_i32_7 : i32
    scf.if %16 {
      %c0 = arith.constant 0 : index
      %c0_8 = arith.constant 0 : index
      %17 = vector.load %arg6[%c0, %c0_8] : memref<8x16xf32, #tpu.memory_space<vmem>>, vector<8x16xf32>
      %18 = vector.shape_cast %17 : vector<8x16xf32> to vector<1x8x16xf32>
      %cst = arith.constant dense<0.000000e+00> : vector<1xf32>
      %19 = vector.multi_reduction <add>, %18, %cst [1, 2] : vector<1x8x16xf32> to vector<1xf32>
      %20 = vector.shape_cast %19 : vector<1xf32> to vector<1x1x1xf32>
      %21 = vector.extract %20[0, 0, 0] : f32 from vector<1x1x1xf32>
      %cst_9 = arith.constant 0.000000e+00 : f32
      %22 = arith.addf %cst_9, %21 : f32
      %c0_10 = arith.constant 0 : index
      %c0_11 = arith.constant 0 : index
      %23 = vector.load %arg7[%c0_10, %c0_11] : memref<4x16xf32, #tpu.memory_space<vmem>>, vector<4x16xf32>
      %24 = vector.shape_cast %23 : vector<4x16xf32> to vector<1x4x16xf32>
      %cst_12 = arith.constant dense<0.000000e+00> : vector<1xf32>
      %25 = vector.multi_reduction <add>, %24, %cst_12 [1, 2] : vector<1x4x16xf32> to vector<1xf32>
      %26 = vector.shape_cast %25 : vector<1xf32> to vector<1x1x1xf32>
      %27 = vector.extract %26[0, 0, 0] : f32 from vector<1x1x1xf32>
      %cst_13 = arith.constant 0.000000e+00 : f32
      %28 = arith.addf %cst_13, %27 : f32
      %29 = tpu.iota {dimensions = array<i32: 0>} : vector<8x128xi32>
      %30 = tpu.iota {dimensions = array<i32: 1>} : vector<8x128xi32>
      %c0_i32_14 = arith.constant 0 : i32
      %31 = vector.broadcast %c0_i32_14 : i32 to vector<8x128xi32>
      %32 = arith.cmpi eq, %29, %31 : vector<8x128xi32>
      %c0_i32_15 = arith.constant 0 : i32
      %33 = vector.broadcast %c0_i32_15 : i32 to vector<8x128xi32>
      %34 = arith.cmpi eq, %30, %33 : vector<8x128xi32>
      %35 = arith.andi %32, %34 : vector<8x128xi1>
      %c0_i32_16 = arith.constant 0 : i32
      %36 = vector.broadcast %c0_i32_16 : i32 to vector<8x128xi32>
      %37 = arith.cmpi eq, %29, %36 : vector<8x128xi32>
      %c1_i32_17 = arith.constant 1 : i32
      %38 = vector.broadcast %c1_i32_17 : i32 to vector<8x128xi32>
      %39 = arith.cmpi eq, %30, %38 : vector<8x128xi32>
      %40 = arith.andi %37, %39 : vector<8x128xi1>
      %cst_18 = arith.constant 0.000000e+00 : f32
      %41 = vector.broadcast %28 : f32 to vector<8x128xf32>
      %42 = vector.broadcast %cst_18 : f32 to vector<8x128xf32>
      %43 = arith.select %40, %41, %42 : vector<8x128xi1>, vector<8x128xf32>
      %44 = vector.broadcast %22 : f32 to vector<8x128xf32>
      %45 = arith.select %35, %44, %43 : vector<8x128xi1>, vector<8x128xf32>
      %c0_19 = arith.constant 0 : index
      %c0_20 = arith.constant 0 : index
      %46 = vector.load %arg5[%c0_19, %c0_20] : memref<8x128xf32, #tpu.memory_space<vmem>>, vector<8x128xf32>
      tpu.vector_store %arg5[%c0_19, %c0_20], %45 {strides = array<i32>} : memref<8x128xf32, #tpu.memory_space<vmem>>, vector<8x128xf32>,
    } else {
    }
    return
  }
  func.func @transform_0(%arg0: i32, %arg1: i32) -> (i32, i32) {
    %c2_i32 = arith.constant 2 : i32
    %0 = arith.muli %arg1, %c2_i32 : i32
    %1 = arith.addi %0, %arg0 : i32
    %c0_i32 = arith.constant 0 : i32
    %2 = arith.minsi %1, %c0_i32 : i32
    %c0_i32_0 = arith.constant 0 : i32
    %c0_i32_1 = arith.constant 0 : i32
    return %2, %c0_i32_0 : i32, i32
  }
  func.func @transform_1(%arg0: i32, %arg1: i32) -> (i32, i32) {
    %c2_i32 = arith.constant 2 : i32
    %0 = arith.muli %arg1, %c2_i32 : i32
    %1 = arith.addi %0, %arg0 : i32
    %c0_i32 = arith.constant 0 : i32
    %2 = arith.minsi %1, %c0_i32 : i32
    %c0_i32_0 = arith.constant 0 : i32
    %c0_i32_1 = arith.constant 0 : i32
    return %2, %c0_i32_0 : i32, i32
  }
  func.func @transform_2(%arg0: i32, %arg1: i32) -> (i32, i32) {
    %c2_i32 = arith.constant 2 : i32
    %0 = arith.muli %arg1, %c2_i32 : i32
    %1 = arith.addi %0, %arg0 : i32
    %c0_i32 = arith.constant 0 : i32
    %2 = arith.minsi %1, %c0_i32 : i32
    %c0_i32_0 = arith.constant 0 : i32
    %c0_i32_1 = arith.constant 0 : i32
    return %2, %c0_i32_0 : i32, i32
  }
  func.func @transform_3(%arg0: i32, %arg1: i32) -> (i32, i32) {
    %c0_i32 = arith.constant 0 : i32
    %c0_i32_0 = arith.constant 0 : i32
    return %arg0, %c0_i32 : i32, i32
  }
}

</mosaic_0001>

<bundles_post_ra>
// kernel: tpu_custom_call.1
= control target key start
LH: loop header
LB: loop body
LE: loop exit
PB: predicated region body
PF: predicated region fallthrough
CT: control target
= control target key end

     0   :  { %s1080_s0 = inlined_call_operand.hbm [shape: f32[8,16], index: 0, kind: input, shape index: {}]   ;;  %s1081_s1 = inlined_call_operand.hbm [shape: f32[4,16], index: 1, kind: input, shape index: {}]   ;;  %s1082_s2 = inlined_call_operand.hbm [shape: f32[4,16], index: 2, kind: input, shape index: {}]   ;;  %s1083_s3 = inlined_call_operand.hbm [shape: f32[16,128], index: 3, kind: output, shape index: {}]  }
   0x1   :  { %1084 = sst [smem:[#allocation14_spill]] %s1081_s1 }
   0x2   :  { %8 = vsyncpa [#allocation5], 0 }
   0x3   :  { %10 = vsyncpa [#allocation5 + $0x1], 0 }
   0x4   :  { %11 = vsyncpa [#allocation8], 0 }
   0x5   :  { %13 = vsyncpa [#allocation8 + $0x1], 0 }
   0x6   :  { %14 = vsyncpa [#allocation6], 0 }
   0x7   :  { %16 = vsyncpa [#allocation6 + $0x1], 0  ;;  %s876_s12 = smov 0   ;;  %s878_s13 = smov 0  }
   0x8   :  { %s880_s14 = smov 0   ;;  %s882_s15 = smov 0  }
   0x9   :  { %s884_s16 = smov 0   ;;  %s886_s17 = smov 0  }
   0xa   :  { %s888_s18 = smov 0   ;;  %s890_s19 = smov 0  }
   0xb LB: > { %s915_s20 = sadd.s32 4294967295, %s850_s19   ;;  %s533_s21 = sadd.s32 4294967294, %s850_s19   ;;  %s850_s19 = sphi %s890_s19, %s22_s19   ;;  %s846_s18 = sphi %s888_s18, %s1097_s18   ;;  %s842_s17 = sphi %s886_s17, %s1096_s17   ;;  %s838_s16 = sphi %s884_s16, %s1070_s16   ;;  %s834_s15 = sphi %s882_s15, %s1095_s15   ;;  %s830_s14 = sphi %s880_s14, %s1094_s14   ;;  %s826_s13 = sphi %s878_s13, %s1093_s13   ;;  %s822_s12 = sphi %s876_s12, %s1092_s12  }
   0xc   : > { %s34_s22 = sadd.s32 1, %s846_s18  ;;  %p819_p1 = scmp.ne.s32.totalorder %s838_s16, 0 }
   0xd   : > { %p36_p0 = scmp.ge.s32.totalorder %s34_s22, 2  ;;  %p57_p2 = scmp.eq.s32.totalorder %s850_s19, 0 }
   0xe   : > { %p62_p3 = scmp.ne.s32.totalorder %s838_s16, %s834_s15  ;;  %p63_p5 = scmp.eq.s32.totalorder %s915_s20, 0 }
   0xf   : > { %s1099_s22 = smov (%p36_p0, %s34_s22), 0  ;;  %p924_p4 = por %p819_p1, %p57_p2 }
  0x10   : > { %p929_p6 = por %p63_p5, %p62_p3  ;;  %s140_s25 = ssub.s32 %s846_s18, %s1099_s22 }
  0x11   : > { %p141_p7 = scmp.eq.s32.totalorder %s140_s25, 0  ;;  %s143_s26 = sadd.s32 1, %s830_s14 }
  0x12   : > { %p153_p8 = scmp.ne.s32.totalorder %s830_s14, %s826_s13  ;;  %p154_p9 = scmp.eq.s32.totalorder %s915_s20, 1 }
  0x13   : > { %s937_s27 = scalar_select %p141_p7, %s830_s14, %s143_s26  }
  0x14   : > { %p159_p10 = scmp.ne.s32.totalorder %s826_s13, %s822_s12  ;;  %p160_p11 = scmp.eq.s32.totalorder %s533_s21, 1 }
  0x15   : > { %p944_p12 = por %p154_p9, %p153_p8  ;;  %p535_p13 = scmp.ge.s32.totalorder %s850_s19, 2 }
  0x16   : > { %p949_p0 = por %p160_p11, %p159_p10  ;;  %p578_p1 = scmp.lt.s32.totalorder %s850_s19, 2 }
  0x17   : > { %s203_s30 = sand.u32 1, %s850_s19   ;;  %s852_s5 = smov [#allocation7]  }
  0x18   : > { %p957_p2 = pnand %p578_p1, %p924_p4  ;;  %s219_s6 = sshll.u32 %s852_s5, 4  ;;  %s220_s6 = int_to_ptr.vmem [resolvable:$true] %s219_s6 }
  0x19   : > { %s1090_s1 = sld [smem:[#allocation14_spill]]  ;;  %s964_s10 = scalar_lea.sflag [#allocation8], %s203_s30 }
  0x1a   : > { %p657_p4 = pneg %p957_p2 }
  0x1f   : > { %s217_s9 = sshll.u32 %s1090_s1, 4  ;;  %s660_s25 = scalar_lea.hbm %s1090_s1, 4  ;;  %s218_s9 = int_to_ptr.hbm [resolvable:$true] %s217_s9 }
  0x20   : > { %s653_s11 = sshra.s32 %s218_s9, 4  ;;  %s654_s11 = int_to_ptr.hbm [resolvable:$true] %s653_s11 }
  0x21   : > { %s655_s15 = scalar_lea.hbm %s654_s11, 4 }
  0x22   : > { %p656_p3 = scmp.ne.s32.totalorder %s654_s11, %s655_s15  ;;  %p662_p8 = scmp.lt.s32.totalorder %s660_s25, %s655_s15 }
  0x24   : > { %p658_p5 = pnand %p657_p4, %p656_p3 }
  0x26   : > { %p659_p7 = pneg %p658_p5 }
  0x28   : > { %p664_p9 = pnand %p662_p8, %p659_p7 }
  0x2a   : > { %667 = shalt.err (!%p664_p9)
}
  0x2b   : > { %570 = dma.hbm_to_vmem [thread:$0]  (!%p957_p2), %s218_s9, 64, %s220_s6, %s964_s10  }
  0x2c   : > { %p542_p10 = scmp.ge.s32.totalorder %s850_s19, 1  ;;  %p247_p11 = scmp.lt.s32.totalorder %s850_s19, 3 }
  0x2d   : > { %s853_s30 = smov [#allocation4]   ;;  %s194_s11 = sshll.u32 %s1080_s0, 4  ;;  %s195_s11 = int_to_ptr.hbm [resolvable:$true] %s194_s11 }
  0x2e   : > { %p979_p1 = pnand %p542_p10, %p247_p11  ;;  %s196_s5 = sshll.u32 %s853_s30, 4  ;;  %s197_s5 = int_to_ptr.vmem [resolvable:$true] %s196_s5 }
  0x2f   : > { %s240_s23 = sshll.u32 %s1082_s2, 4  ;;  %s683_s25 = sshra.s32 %s195_s11, 4  ;;  %s684_s25 = int_to_ptr.hbm [resolvable:$true] %s683_s25  ;;  %s241_s23 = int_to_ptr.hbm [resolvable:$true] %s240_s23 }
  0x30   : > { %s685_s6 = scalar_lea.hbm %s684_s25, 8  ;;  %s690_s1 = scalar_lea.hbm %s1080_s0, 8 }
  0x31   : > { %p686_p3 = scmp.ne.s32.totalorder %s684_s25, %s685_s6  ;;  %p692_p8 = scmp.lt.s32.totalorder %s690_s1, %s685_s6 }
  0x33   : > { %p688_p5 = pnand %p686_p3, %p657_p4 }
  0x35   : > { %p689_p7 = pneg %p688_p5 }
  0x37   : > { %p694_p9 = pnand %p692_p8, %p689_p7 }
  0x39   : > { %697 = shalt.err (!%p694_p9)
}
  0x3a   : > { %567 = dma.hbm_to_vmem [thread:$0]  (!%p957_p2), %s195_s11, 128, %s197_s5, [#allocation5]  }
  0x3b   : > { %s854_s7 = smov [#allocation9]   ;;  %s713_s15 = sshra.s32 %s241_s23, 4  ;;  %s714_s15 = int_to_ptr.hbm [resolvable:$true] %s713_s15 }
  0x3c   : > { %s242_s8 = sshll.u32 %s854_s7, 4  ;;  %s715_s21 = scalar_lea.hbm %s714_s15, 4  ;;  %s243_s8 = int_to_ptr.vmem [resolvable:$true] %s242_s8 }
  0x3d   : > { %p716_p10 = scmp.ne.s32.totalorder %s714_s15, %s715_s21  ;;  %s720_s6 = scalar_lea.hbm %s1082_s2, 4 }
  0x3e   : > { %p722_p5 = scmp.lt.s32.totalorder %s720_s6, %s715_s21 }
  0x3f   : > { %p718_p11 = pnand %p716_p10, %p657_p4 }
  0x41   : > { %p719_p3 = pneg %p718_p11 }
  0x43   : > { %p724_p7 = pnand %p722_p5, %p719_p3 }
  0x45   : > { %727 = shalt.err (!%p724_p7)
}
  0x46   : > { %573 = dma.hbm_to_vmem [thread:$0]  (!%p957_p2), %s241_s23, 64, %s243_s8, %s964_s10  }
  0x47   : > { %251 = sbr.rel (%p979_p1) target bundleno = 297 (0x129), region = 32  ;;  %s253_s5 = sand.u32 (!%p979_p1), 1, %s838_s16  }
  0x48   : > { %s543_s11 = sshll.u32 (!%p979_p1), %s253_s5, 3  ;;  %s254_s9 = scalar_lea.sflag (!%p979_p1), [#allocation5], %s253_s5 }
  0x49   : > { %s257_s30 = scalar_lea.vmem (!%p979_p1), [#allocation4], %s543_s11 }
  0x4c   : > { %808 = dma.done.wait (%p929_p6), %s254_s9, 128  }
  0x4d   : > { %810 = vsyncadd (%p929_p6), %s254_s9, 4294967168  ;;  %s263_s7 = sand.u32 1, %s915_s20   ;;  %s544_s4 = sshll.u32 %s253_s5, 2 }
  0x4e   : > { %s264_s15 = scalar_lea.sflag [#allocation8], %s263_s7  ;;  %s267_s10 = scalar_lea.vmem [#allocation7], %s544_s4 }
  0x4f   : > { %812 = dma.done.wait (%p929_p6), %s264_s15, 128  }
  0x50   : > { %814 = vsyncadd (%p929_p6), %s264_s15, 4294967168  ;;  %s308_s26 = sand.u32 1, %s826_s13   ;;  %vm329_vm0 = vcmask 130048   ;;  %vm331_vm1 = vcmask 125952   ;;  %v855_v0 = vmov 0.0   ;;  %s277_s20 = scalar_lea.vmem [#allocation9], %s544_s4 }
  0x51   : > { %s1021_s23 = sshll.u32 %s308_s26, 3  ;;  %330 = vst.msk [vmem:[#allocation2] sm:$0xff] %vm329_vm0, %v855_v0  ;;  %p547_p2 = scmp.ge.s32.totalorder %s842_s17, 1 }
  0x52   : > { %332 = vst.msk [vmem:[#allocation3] sm:$0xf] %vm331_vm1, %v855_v0  ;;  %s310_s8 = scalar_lea.vmem [#allocation10], %s1021_s23 }
  0x53   : > { %336 = sbr.rel (%p547_p2) target bundleno = 103 (0x67), region = 52 }
  0x58   : > { %v343_v1 = vld [vmem:[%s267_s10] sm:$0xf]  ;;  %v337_v3 = vld [vmem:[%s257_s30] sm:$0xff]  ;;  %v348_v8 = vld [vmem:[%s277_s20] sm:$0xf] }
  0x59   : > { %v344_v2 = vld [vmem:[#allocation3] sm:$0xf]  ;;  %v338_v5 = vmul.f32 %v337_v3, %v337_v3  ;;  %v339_v6 = vld [vmem:[#allocation2] sm:$0xff] }
  0x5a   : > { %v345_v4 = vadd.f32 %v344_v2, %v343_v1 }
  0x5b   : > { %v340_v7 = vadd.f32 %v339_v6, %v338_v5 }
  0x5c   : > { %347 = vst.msk [vmem:[#allocation3] sm:$0xf] %vm331_vm1, %v345_v4 }
  0x5d   : > { %342 = vst.msk [vmem:[#allocation2] sm:$0xff] %vm329_vm0, %v340_v7 }
  0x63   : > { %v349_v9 = vld [vmem:[#allocation3] sm:$0xf] }
  0x64   : > { %v350_v10 = vadd.f32 %v349_v9, %v348_v8 }
  0x66   : > { %351 = vst.msk [vmem:[#allocation3] sm:$0xf] %vm331_vm1, %v350_v10 }
  0x67 PF: > { %v355_v11 = vld [vmem:[#allocation2] sm:$0xff]  ;;  %v381_v29 = vlaneseq  ;;  %s549_s24 = sshll.u32 %s842_s17, 3  ;;  %s408_s6 = sshll.u32 %s310_s8, 4  ;;  %s409_s6 = int_to_ptr.vmem [resolvable:$true] %s408_s6 }
  0x68   : > { %v357_v12 = vsel %vm329_vm0, %v355_v11, 0.0  ;;  %s406_s1 = scalar_lea.hbm %s1083_s3, %s549_s24  ;;  %s396_s17 = scalar_lea.sflag [#allocation6], %s308_s26 }
  0x69   : > { %358 = vadd.xlane.f32.xlu0 %v357_v12  ;;  %v382_v30 = vshrl.u32 %v381_v29, 7  ;;  %v384_v31 = vand.u32 127, %v381_v29  ;;  %s410_s11 = sshll.u32 %s406_s1, 4  ;;  %s763_s10 = scalar_lea.hbm %s1083_s3, 16  ;;  %s411_s11 = int_to_ptr.hbm [resolvable:$true] %s410_s11 }
  0x6a   : > { %s757_s30 = sshra.s32 %s411_s11, 4  ;;  %s758_s30 = int_to_ptr.hbm [resolvable:$true] %s757_s30 }
  0x6b   : > { %vm385_vm2 = vcmp.eq.s32.totalorder %v382_v30, 0  ;;  %vm388_vm3 = vcmp.eq.s32.totalorder %v384_v31, 1  ;;  %vm386_vm4 = vcmp.eq.s32.totalorder %v384_v31, 0  ;;  %s759_s7 = scalar_lea.hbm %s758_s30, 8  ;;  %p764_p8 = scmp.lt.s32.totalorder %s758_s30, %s1083_s3 }
  0x6c   : > { %vm389_vm5 = vmand %vm385_vm2, %vm388_vm3  ;;  %p760_p6 = scmp.ne.s32.totalorder %s758_s30, %s759_s7  ;;  %p765_p9 = scmp.lt.s32.totalorder %s763_s10, %s759_s7 }
  0x6d   : > { %v368_v13 = vld [vmem:[#allocation3] sm:$0xf]  ;;  %vm387_vm6 = vmand %vm385_vm2, %vm386_vm4 }
  0x6e   : > { %v370_v14 = vsel %vm331_vm1, %v368_v13, 0.0  ;;  %p761_p4 = pnand %p760_p6, %p944_p12  ;;  %p766_p10 = por %p765_p9, %p764_p8 }
  0x70   : > { %p762_p1 = pneg %p761_p4 }
  0x71   : > { %371 = vadd.xlane.f32.xlu0 %v370_v14 }
  0x72   : > { %p767_p11 = pnand %p766_p10, %p762_p1 }
  0xdc   : > { %v359_v15 = vpop.xlane.xlu0 %358 }
  0xdd   : > { %v360_v16 = vrot.slane %v359_v15, 4 }
  0xdf   : > { %v361_v17 = vadd.f32 %v360_v16, %v359_v15 }
  0xe1   : > { %v362_v18 = vrot.slane %v361_v17, 2 }
  0xe3   : > { %v363_v19 = vadd.f32 %v362_v18, %v361_v17 }
  0xe4   : > { %v372_v20 = vpop.xlane.xlu0 %371 }
  0xe5   : > { %v373_v21 = vrot.slane %v372_v20, 4  ;;  %v364_v22 = vrot.slane %v363_v19, 1 }
  0xe7   : > { %v374_v23 = vadd.f32 %v373_v21, %v372_v20  ;;  %v365_v24 = vadd.f32 %v364_v22, %v363_v19 }
  0xe9   : > { %v375_v25 = vrot.slane %v374_v23, 2  ;;  %552 = vpush %v365_v24 }
  0xeb   : > { %v376_v26 = vadd.f32 %v375_v25, %v374_v23 }
  0xed   : > { %v377_v27 = vrot.slane %v376_v26, 1 }
  0xef   : > { %v378_v28 = vadd.f32 %v377_v27, %v376_v26 }
  0xf1   : > { %554 = vpush %v378_v28 }
 0x11a   : > { %s553_s5 = spop %552 }
 0x11b   : > { %v392_v33 = vstv %s553_s5 }
 0x122   : > { %s555_s9 = spop %554 }
 0x123   : > { %v390_v32 = vstv %s555_s9 }
 0x124   : > { %v391_v34 = vsel %vm389_vm5, %v390_v32, 0.0 }
 0x125   : > { %v393_v35 = vsel %vm387_vm6, %v392_v33, %v391_v34 }
 0x126   : > { %394 = vst [vmem:[%s310_s8] sm:$0xff] %v393_v35 }
 0x127   : > { %770 = shalt.err (!%p767_p11)
}
 0x128   : > { %562 = dma.vmem_to_hbm [thread:$0]  (%p944_p12), %s409_s6, 128, %s411_s11, %s396_s17  }
 0x129 PF: > { %s422_s26 = sand.u32 1, %s822_s12   ;;  %p575_p3 = pnand %p535_p13, %p949_p0 }
 0x12a   : > { %s423_s23 = scalar_lea.sflag [#allocation6], %s422_s26 }
 0x12b   : > { %p576_p5 = pneg %p575_p3 }
 0x12d   : > { %816 = dma.done.wait (%p576_p5), %s423_s23, 128  }
 0x12e   : > { %818 = vsyncadd (%p576_p5), %s423_s23, 4294967168  ;;  %s22_s19 = sadd.s32 1, %s850_s19   ;;  %s1092_s12 = smov %s826_s13 }
 0x12f   : > { %p19_p7 = scmp.ge.s32.totalorder %s22_s19, 4   ;;  %s1093_s13 = smov %s830_s14 }
 0x130   : > { %s1094_s14 = smov %s937_s27  ;;  %s1095_s15 = smov %s838_s16 }
 0x131   : > { %s1070_s16 = smov 0   ;;  %s1096_s17 = smov %s846_s18 }
 0x132   : > { %s1097_s18 = smov %s1099_s22  ;;  %21 = sbr.rel (!%p19_p7) target bundleno = 11 (0xb), region = 113 }
 0x137   :  { %429 = vsyncpa [#allocation5], 1 }
 0x138   :  { %431 = vsyncpa [#allocation5 + $0x1], 1 }
 0x139   :  { %432 = vsyncpa [#allocation8], 1 }
 0x13a   :  { %434 = vsyncpa [#allocation8 + $0x1], 1 }
 0x13b   :  { %435 = vsyncpa [#allocation6], 1 }
 0x13c   :  { %437 = vsyncpa [#allocation6 + $0x1], 1 }

</bundles_post_ra>
